<compile_context>
chip_gen: v7x
topology: tpu7x:2x2x1
jax: 0.10.0
libtpu: 0.0.40
codegen_flags: <defaults>
</compile_context>

<pallas_src>
import math
from functools import partial

import jax
import jax.numpy as jnp
from jax.experimental import pallas as pl
from jax.experimental.pallas import tpu as pltpu


# ----------------------------------------------------------------------------
# Pass 1: fused Q/K/V projection (one pass over x, three GEMMs per row tile).
# ----------------------------------------------------------------------------
def _qkv_proj_kernel(x_ref, wq_ref, bq_ref, wk_ref, bk_ref, wv_ref, bv_ref,
                     q_ref, k_ref, v_ref):
    x = x_ref[0]                                                     # (TM, H)
    # Weights pre-transposed to (in, out); Wq/bq pre-scaled by 1/sqrt(H).
    q = jnp.dot(x, wq_ref[...], preferred_element_type=jnp.float32) + bq_ref[...]
    k = jnp.dot(x, wk_ref[...], preferred_element_type=jnp.float32) + bk_ref[...]
    v = jnp.dot(x, wv_ref[...], preferred_element_type=jnp.float32) + bv_ref[...]
    q_ref[0] = q.astype(q_ref.dtype)
    k_ref[0] = k.astype(k_ref.dtype)
    v_ref[0] = v.astype(v_ref.dtype)


# ----------------------------------------------------------------------------
# Pass 2: flash-style attention over the pre-projected Q/K/V.
# ----------------------------------------------------------------------------
def _attn_kernel(*refs, has_mask, mxu_dtype, nk_tiles):
    if has_mask:
        (q_ref, k_ref, v_ref, bias_ref,
         ctx_ref, probs_ref,
         m_scr, l_scr, acc_scr, mtile_scr) = refs
    else:
        bias_ref = None
        (q_ref, k_ref, v_ref,
         ctx_ref, probs_ref,
         m_scr, l_scr, acc_scr, mtile_scr) = refs

    ki = pl.program_id(2)
    tk = k_ref.shape[1]            # static key-tile size from the BlockSpec

    # --- first key tile for this (batch, q-tile): reset the running state.
    @pl.when(ki == 0)
    def _():
        m_scr[...] = jnp.full_like(m_scr, -jnp.inf)
        l_scr[...] = jnp.zeros_like(l_scr)
        acc_scr[...] = jnp.zeros_like(acc_scr)

    # --- (TQ, TK) score tile on the MXU: contract on H, f32 accumulate.
    s = jax.lax.dot_general(q_ref[0], k_ref[0],
                            dimension_numbers=(((1,), (1,)), ((), ())),
                            preferred_element_type=jnp.float32)
    # TODO(synk): if the bundle dump shows a per-step vxpose of the K tile,
    # emit K^T from the projection pass and use a plain NN matmul here.

    if has_mask:
        # bias = -1e9 at masked positions, +inf elsewhere (bf16 stream); a
        # single min() reproduces masked_fill exactly, incl. fully-masked rows.
        s = jnp.minimum(s, bias_ref[0].astype(jnp.float32))

    # --- online softmax update.
    m_prev = m_scr[...]
    m_new = jnp.maximum(m_prev, jnp.max(s, axis=-1, keepdims=True))
    corr = jnp.exp(m_prev - m_new)
    p = jnp.exp(s - m_new)                                           # (TQ, TK)
    l_scr[...] = corr * l_scr[...] + jnp.sum(p, axis=-1, keepdims=True)
    acc_scr[...] = corr * acc_scr[...] + jnp.dot(
        p.astype(mxu_dtype), v_ref[0], preferred_element_type=jnp.float32)
    m_scr[...] = m_new

    # Stash the tile-local numerators (already exp'd) plus their reference max;
    # the finalize pass only rescales, so every score element is exp'd once.
    col = pl.multiple_of(ki * tk, tk)
    probs_ref[0, :, pl.ds(col, tk)] = p.astype(probs_ref.dtype)
    mtile_scr[:, pl.ds(ki, 1)] = m_new

    # --- last key tile: normalize and emit context + attention probabilities.
    @pl.when(ki == nk_tiles - 1)
    def _():
        # exact divide keeps f32 parity with the reference; approx=True would
        # move it to the EUP at ~2^-12 relative error.
        inv_l = pl.reciprocal(l_scr[...], approx=False)
        ctx_ref[0] = (acc_scr[...] * inv_l).astype(ctx_ref.dtype)
        # Per-tile rescale exp(m_tile - m_final) / l: nk exps per row, not S.
        scales = jnp.exp(mtile_scr[...] - m_scr[...]) * inv_l        # (TQ, nk)
        for j in range(nk_tiles):        # static unroll: one broadcast mul per tile
            cj = j * tk
            blk = probs_ref[0, :, cj:cj + tk].astype(jnp.float32)
            probs_ref[0, :, cj:cj + tk] = (blk * scales[:, j:j + 1]).astype(probs_ref.dtype)


def _pick_tile(n):
    # MXU-friendly tiles; fall back to the whole axis for small demo shapes.
    for t in (256, 128):
        if n % t == 0:
            return t
    return n


def _pick_q_tile(s, probs_itemsize):
    # Cap the resident (TQ, S) probs block at ~4 MiB so double-buffered outputs
    # + inputs + scratch stay inside v7x's 64 MiB VMEM; v5e/v6e just get headroom.
    t = _pick_tile(s)
    if t > 128 and s % 128 == 0 and t * s * probs_itemsize > (4 << 20):
        t = 128
    return t


def self_attention(x, params, mask=None, *, mxu_dtype=jnp.bfloat16,
                   probs_dtype=jnp.float32, tq=None, tk=None, tm=None):
    """x: (B, S, H) float32.  params[name] = (W (out,in), b (out,)) in PyTorch
    nn.Linear layout.  mask: optional (B,S,S) / (1,S,S) / (S,S), 0 == masked.
    Returns (context (B,S,H) f32, attention_probs (B,S,S) probs_dtype).
    probs_dtype=jnp.bfloat16 halves the dominant O(B*S^2) writeback if the
    consumer tolerates it."""
    B, S, H = x.shape
    itm = jnp.dtype(mxu_dtype).itemsize
    pb = jnp.dtype(probs_dtype).itemsize

    TM = tm or _pick_tile(S)
    TQ = tq or _pick_q_tile(S, pb)
    TK = tk or _pick_tile(S)
    assert S % TM == 0 and S % TQ == 0 and S % TK == 0
    nq, nk = S // TQ, S // TK
    has_mask = mask is not None

    wq, bq = params["query"]
    wk, bk = params["key"]
    wv, bv = params["value"]
    scale = 1.0 / math.sqrt(float(H))

    # Pre-transpose weights to (in, out) and fold the 1/sqrt(H) softmax scale
    # into the Q projection so the kernels never transpose or rescale.
    wq_t = (wq.T * scale).astype(mxu_dtype)
    wk_t = wk.T.astype(mxu_dtype)
    wv_t = wv.T.astype(mxu_dtype)
    bq2 = (bq * scale).reshape(1, H).astype(jnp.float32)
    bk2 = bk.reshape(1, H).astype(jnp.float32)
    bv2 = bv.reshape(1, H).astype(jnp.float32)
    x_in = x.astype(mxu_dtype)

    # ---------------- pass 1: Q/K/V projection ----------------
    const2d = lambda shape: pl.BlockSpec(shape, lambda b, i: (0, 0))
    row_spec = pl.BlockSpec((1, TM, H), lambda b, i: (b, i, 0))
    qkv_sds = jax.ShapeDtypeStruct((B, S, H), mxu_dtype)
    proj_cost = pl.CostEstimate(
        flops=int(6 * B * S * H * H),
        transcendentals=0,
        bytes_accessed=int(4 * B * S * H * itm + 3 * H * H * itm + 3 * H * 4))
    q, k, v = pl.pallas_call(
        _qkv_proj_kernel,
        out_shape=(qkv_sds, qkv_sds, qkv_sds),
        grid_spec=pltpu.PrefetchScalarGridSpec(
            num_scalar_prefetch=0,
            grid=(B, S // TM),
            in_specs=[row_spec,
                      const2d((H, H)), const2d((1, H)),
                      const2d((H, H)), const2d((1, H)),
                      const2d((H, H)), const2d((1, H))],
            out_specs=[row_spec, row_spec, row_spec],
        ),
        compiler_params=pltpu.CompilerParams(
            dimension_semantics=("parallel", "parallel")),
        cost_estimate=proj_cost,
    )(x_in, wq_t, bq2, wk_t, bk2, wv_t, bv2)

    # ---------------- pass 2: fused attention ----------------
    in_specs = [
        pl.BlockSpec((1, TQ, H), lambda b, qi, ki: (b, qi, 0)),   # Q (resident over ki)
        pl.BlockSpec((1, TK, H), lambda b, qi, ki: (b, ki, 0)),   # K
        pl.BlockSpec((1, TK, H), lambda b, qi, ki: (b, ki, 0)),   # V
    ]
    operands = [q, k, v]
    if has_mask:
        mask3 = mask if mask.ndim == 3 else mask.reshape((1,) + mask.shape)
        # "replace" bias: -1e9 where masked, +inf elsewhere; streamed as bf16
        # (half the DMA of an f32 mask) without materializing B broadcast copies.
        bias = jnp.where(mask3 == 0, jnp.float32(-1e9),
                         jnp.float32(jnp.inf)).astype(jnp.bfloat16)
        if bias.shape[0] == B:
            bias_map = lambda b, qi, ki: (b, qi, ki)
        else:
            bias_map = lambda b, qi, ki: (0, qi, ki)
        in_specs.append(pl.BlockSpec((1, TQ, TK), bias_map))
        operands.append(bias)

    # Explicit VMEM budget (double-buffered blocks + scratch) with headroom.
    vmem_est = (2 * TQ * H * itm + 4 * TK * H * itm
                + (2 * TQ * TK * 2 if has_mask else 0)
                + 2 * TQ * H * 4 + 2 * TQ * S * pb
                + TQ * (H + 2) * 4 + TQ * max(nk, 128) * 4)
    vmem_limit = int(min(max(int(vmem_est * 1.5) + (4 << 20), 32 << 20), 112 << 20))

    attn_cost = pl.CostEstimate(
        flops=int(4 * B * S * S * H),
        transcendentals=int(B * S * S + 2 * B * S * nk),
        bytes_accessed=int(B * S * H * itm * (1 + 2 * nq)          # q + k/v re-reads
                           + (B * S * S * 2 if has_mask else 0)
                           + B * S * H * 4 + B * S * S * pb))

    kernel = partial(_attn_kernel, has_mask=has_mask, mxu_dtype=mxu_dtype,
                     nk_tiles=nk)
    ctx, probs = pl.pallas_call(
        kernel,
        out_shape=(
            jax.ShapeDtypeStruct((B, S, H), jnp.float32),
            jax.ShapeDtypeStruct((B, S, S), probs_dtype),
        ),
        grid_spec=pltpu.PrefetchScalarGridSpec(
            num_scalar_prefetch=0,
            grid=(B, nq, nk),
            in_specs=in_specs,
            out_specs=[
                pl.BlockSpec((1, TQ, H), lambda b, qi, ki: (b, qi, 0)),  # context
                pl.BlockSpec((1, TQ, S), lambda b, qi, ki: (b, qi, 0)),  # probs (resident over ki)
            ],
            scratch_shapes=[
                pltpu.VMEM((TQ, 1), jnp.float32),    # running row max
                pltpu.VMEM((TQ, 1), jnp.float32),    # running row sum
                pltpu.VMEM((TQ, H), jnp.float32),    # context accumulator
                pltpu.VMEM((TQ, nk), jnp.float32),   # per-tile reference max
            ],
        ),
        compiler_params=pltpu.CompilerParams(
            # v7x: two TensorCores split the (b, qi) parallel axes; keep B*nq >= 2.
            dimension_semantics=("parallel", "parallel", "arbitrary"),
            vmem_limit_bytes=vmem_limit),
        cost_estimate=attn_cost,
    )(*operands)
    return ctx, probs


def _reference(x, params, mask=None):
    H = x.shape[-1]
    wq, bq = params["query"]
    wk, bk = params["key"]
    wv, bv = params["value"]
    q = x @ wq.T + bq
    k = x @ wk.T + bk
    v = x @ wv.T + bv
    scores = jnp.einsum("bqh,bkh->bqk", q, k) / math.sqrt(H)
    if mask is not None:
        scores = jnp.where(mask == 0, -1e9, scores)
    probs = jax.nn.softmax(scores, axis=-1)
    return jnp.einsum("bqk,bkh->bqh", probs, v), probs


if __name__ == "__main__":
    B, S, H = 2, 8, 32          # heads=12 in the PyTorch module is unused by forward()

    key = jax.random.PRNGKey(0)
    kx, kq, kbq, kk, kbk, kv, kbv, km = jax.random.split(key, 8)
    lim = 1.0 / math.sqrt(H)
    params = {
        "query": (jax.random.uniform(kq,  (H, H), jnp.float32, -lim, lim),
                  jax.random.uniform(kbq, (H,),   jnp.float32, -lim, lim)),
        "key":   (jax.random.uniform(kk,  (H, H), jnp.float32, -lim, lim),
                  jax.random.uniform(kbk, (H,),   jnp.float32, -lim, lim)),
        "value": (jax.random.uniform(kv,  (H, H), jnp.float32, -lim, lim),
                  jax.random.uniform(kbv, (H,),   jnp.float32, -lim, lim)),
    }
    x = jax.random.normal(kx, (B, S, H), jnp.float32)
    mask = (jax.random.uniform(km, (B, S, S)) > 0.3).astype(jnp.float32)

    # 1) exact path (f32 MXU operands): tight match to the PyTorch forward.
    ctx, probs = self_attention(x, params, mask=None, mxu_dtype=jnp.float32)
    jax.block_until_ready((ctx, probs))
    ctx_ref, probs_ref = _reference(x, params, mask=None)
    assert jnp.allclose(ctx, ctx_ref, atol=1e-5, rtol=1e-5)
    assert jnp.allclose(probs, probs_ref, atol=1e-5, rtol=1e-5)

    # 2) masked path (exercises the bf16 min-bias mask variant).
    ctx_m, probs_m = self_attention(x, params, mask=mask, mxu_dtype=jnp.float32)
    jax.block_until_ready((ctx_m, probs_m))
    ctx_mr, probs_mr = _reference(x, params, mask=mask)
    assert jnp.allclose(ctx_m, ctx_mr, atol=1e-5, rtol=1e-5)
    assert jnp.allclose(probs_m, probs_mr, atol=1e-5, rtol=1e-5)

    # 3) fast path (default): bf16 MXU operands, f32 accumulate + f32 softmax.
    ctx_bf, probs_bf = self_attention(x, params, mask=None)
    jax.block_until_ready((ctx_bf, probs_bf))
    assert jnp.allclose(ctx_bf, ctx_ref, atol=3e-2, rtol=3e-2)
    assert jnp.allclose(probs_bf, probs_ref, atol=3e-2, rtol=3e-2)

    print("KERNEL_OK")
</pallas_src>

<mosaic_0001>
module attributes {stable_mosaic.version = 11 : i64} {
  func.func @_qkv_proj_kernel(%arg0: i32, %arg1: i32, %arg2: memref<1x8x32xf32, #tpu.memory_space<vmem>>, %arg3: memref<32x32xf32, #tpu.memory_space<vmem>>, %arg4: memref<1x32xf32, #tpu.memory_space<vmem>>, %arg5: memref<32x32xf32, #tpu.memory_space<vmem>>, %arg6: memref<1x32xf32, #tpu.memory_space<vmem>>, %arg7: memref<32x32xf32, #tpu.memory_space<vmem>>, %arg8: memref<1x32xf32, #tpu.memory_space<vmem>>, %arg9: memref<1x8x32xf32, #tpu.memory_space<vmem>>, %arg10: memref<1x8x32xf32, #tpu.memory_space<vmem>>, %arg11: memref<1x8x32xf32, #tpu.memory_space<vmem>>) attributes {dimension_semantics = [#tpu.dimension_semantics<parallel>, #tpu.dimension_semantics<parallel>], iteration_bounds = array<i64: 2, 1>, scalar_prefetch = 0 : i64, scratch_operands = 0 : i64, tpu.core_type = #tpu.core_type<tc>, window_params = [{transform_indices = @transform_0, window_bounds = array<i64: 1, 8, 32>}, {pipeline_mode = #tpu.pipeline_mode<synchronous>, transform_indices = @transform_1, window_bounds = array<i64: 32, 32>}, {pipeline_mode = #tpu.pipeline_mode<synchronous>, transform_indices = @transform_2, window_bounds = array<i64: 1, 32>}, {pipeline_mode = #tpu.pipeline_mode<synchronous>, transform_indices = @transform_3, window_bounds = array<i64: 32, 32>}, {pipeline_mode = #tpu.pipeline_mode<synchronous>, transform_indices = @transform_4, window_bounds = array<i64: 1, 32>}, {pipeline_mode = #tpu.pipeline_mode<synchronous>, transform_indices = @transform_5, window_bounds = array<i64: 32, 32>}, {pipeline_mode = #tpu.pipeline_mode<synchronous>, transform_indices = @transform_6, window_bounds = array<i64: 1, 32>}, {transform_indices = @transform_7, window_bounds = array<i64: 1, 8, 32>}, {transform_indices = @transform_8, window_bounds = array<i64: 1, 8, 32>}, {transform_indices = @transform_9, window_bounds = array<i64: 1, 8, 32>}]} {
    %c0 = arith.constant 0 : index
    %c0_0 = arith.constant 0 : index
    %c0_1 = arith.constant 0 : index
    %0 = vector.load %arg2[%c0, %c0_0, %c0_1] : memref<1x8x32xf32, #tpu.memory_space<vmem>>, vector<1x8x32xf32>
    %1 = vector.shape_cast %0 : vector<1x8x32xf32> to vector<8x32xf32>
    %c0_2 = arith.constant 0 : index
    %c0_3 = arith.constant 0 : index
    %2 = vector.load %arg3[%c0_2, %c0_3] : memref<32x32xf32, #tpu.memory_space<vmem>>, vector<32x32xf32>
    %cst = arith.constant dense<0.000000e+00> : vector<8x32xf32>
    %3 = tpu.matmul %1, %2, %cst {dimension_numbers = #tpu.dot_dimension_numbers<[1], [0], [0], [1], [0, 0, 1, 1], [], []>} : vector<8x32xf32>, vector<32x32xf32>, vector<8x32xf32> -> vector<8x32xf32>
    %c0_4 = arith.constant 0 : index
    %c0_5 = arith.constant 0 : index
    %4 = vector.load %arg4[%c0_4, %c0_5] : memref<1x32xf32, #tpu.memory_space<vmem>>, vector<1x32xf32>
    %5 = vector.broadcast %4 : vector<1x32xf32> to vector<8x32xf32>
    %6 = arith.addf %3, %5 : vector<8x32xf32>
    %c0_6 = arith.constant 0 : index
    %c0_7 = arith.constant 0 : index
    %7 = vector.load %arg5[%c0_6, %c0_7] : memref<32x32xf32, #tpu.memory_space<vmem>>, vector<32x32xf32>
    %cst_8 = arith.constant dense<0.000000e+00> : vector<8x32xf32>
    %8 = tpu.matmul %1, %7, %cst_8 {dimension_numbers = #tpu.dot_dimension_numbers<[1], [0], [0], [1], [0, 0, 1, 1], [], []>} : vector<8x32xf32>, vector<32x32xf32>, vector<8x32xf32> -> vector<8x32xf32>
    %c0_9 = arith.constant 0 : index
    %c0_10 = arith.constant 0 : index
    %9 = vector.load %arg6[%c0_9, %c0_10] : memref<1x32xf32, #tpu.memory_space<vmem>>, vector<1x32xf32>
    %10 = vector.broadcast %9 : vector<1x32xf32> to vector<8x32xf32>
    %11 = arith.addf %8, %10 : vector<8x32xf32>
    %c0_11 = arith.constant 0 : index
    %c0_12 = arith.constant 0 : index
    %12 = vector.load %arg7[%c0_11, %c0_12] : memref<32x32xf32, #tpu.memory_space<vmem>>, vector<32x32xf32>
    %cst_13 = arith.constant dense<0.000000e+00> : vector<8x32xf32>
    %13 = tpu.matmul %1, %12, %cst_13 {dimension_numbers = #tpu.dot_dimension_numbers<[1], [0], [0], [1], [0, 0, 1, 1], [], []>} : vector<8x32xf32>, vector<32x32xf32>, vector<8x32xf32> -> vector<8x32xf32>
    %c0_14 = arith.constant 0 : index
    %c0_15 = arith.constant 0 : index
    %14 = vector.load %arg8[%c0_14, %c0_15] : memref<1x32xf32, #tpu.memory_space<vmem>>, vector<1x32xf32>
    %15 = vector.broadcast %14 : vector<1x32xf32> to vector<8x32xf32>
    %16 = arith.addf %13, %15 : vector<8x32xf32>
    %c0_16 = arith.constant 0 : index
    %c0_17 = arith.constant 0 : index
    %c0_18 = arith.constant 0 : index
    %17 = vector.load %arg9[%c0_16, %c0_17, %c0_18] : memref<1x8x32xf32, #tpu.memory_space<vmem>>, vector<1x8x32xf32>
    %18 = vector.shape_cast %17 : vector<1x8x32xf32> to vector<8x32xf32>
    %19 = vector.shape_cast %6 : vector<8x32xf32> to vector<1x8x32xf32>
    tpu.vector_store %arg9[%c0_16, %c0_17, %c0_18], %19 {strides = array<i32>} : memref<1x8x32xf32, #tpu.memory_space<vmem>>, vector<1x8x32xf32>,
    %c0_19 = arith.constant 0 : index
    %c0_20 = arith.constant 0 : index
    %c0_21 = arith.constant 0 : index
    %20 = vector.load %arg10[%c0_19, %c0_20, %c0_21] : memref<1x8x32xf32, #tpu.memory_space<vmem>>, vector<1x8x32xf32>
    %21 = vector.shape_cast %20 : vector<1x8x32xf32> to vector<8x32xf32>
    %22 = vector.shape_cast %11 : vector<8x32xf32> to vector<1x8x32xf32>
    tpu.vector_store %arg10[%c0_19, %c0_20, %c0_21], %22 {strides = array<i32>} : memref<1x8x32xf32, #tpu.memory_space<vmem>>, vector<1x8x32xf32>,
    %c0_22 = arith.constant 0 : index
    %c0_23 = arith.constant 0 : index
    %c0_24 = arith.constant 0 : index
    %23 = vector.load %arg11[%c0_22, %c0_23, %c0_24] : memref<1x8x32xf32, #tpu.memory_space<vmem>>, vector<1x8x32xf32>
    %24 = vector.shape_cast %23 : vector<1x8x32xf32> to vector<8x32xf32>
    %25 = vector.shape_cast %16 : vector<8x32xf32> to vector<1x8x32xf32>
    tpu.vector_store %arg11[%c0_22, %c0_23, %c0_24], %25 {strides = array<i32>} : memref<1x8x32xf32, #tpu.memory_space<vmem>>, vector<1x8x32xf32>,
    return
  }
  func.func @transform_0(%arg0: i32, %arg1: i32) -> (i32, i32, i32) {
    %c0_i32 = arith.constant 0 : i32
    %c0_i32_0 = arith.constant 0 : i32
    return %arg0, %arg1, %c0_i32 : i32, i32, i32
  }
  func.func @transform_1(%arg0: i32, %arg1: i32) -> (i32, i32) {
    %c0_i32 = arith.constant 0 : i32
    %c0_i32_0 = arith.constant 0 : i32
    %c0_i32_1 = arith.constant 0 : i32
    return %c0_i32, %c0_i32_0 : i32, i32
  }
  func.func @transform_2(%arg0: i32, %arg1: i32) -> (i32, i32) {
    %c0_i32 = arith.constant 0 : i32
    %c0_i32_0 = arith.constant 0 : i32
    %c0_i32_1 = arith.constant 0 : i32
    return %c0_i32, %c0_i32_0 : i32, i32
  }
  func.func @transform_3(%arg0: i32, %arg1: i32) -> (i32, i32) {
    %c0_i32 = arith.constant 0 : i32
    %c0_i32_0 = arith.constant 0 : i32
    %c0_i32_1 = arith.constant 0 : i32
    return %c0_i32, %c0_i32_0 : i32, i32
  }
  func.func @transform_4(%arg0: i32, %arg1: i32) -> (i32, i32) {
    %c0_i32 = arith.constant 0 : i32
    %c0_i32_0 = arith.constant 0 : i32
    %c0_i32_1 = arith.constant 0 : i32
    return %c0_i32, %c0_i32_0 : i32, i32
  }
  func.func @transform_5(%arg0: i32, %arg1: i32) -> (i32, i32) {
    %c0_i32 = arith.constant 0 : i32
    %c0_i32_0 = arith.constant 0 : i32
    %c0_i32_1 = arith.constant 0 : i32
    return %c0_i32, %c0_i32_0 : i32, i32
  }
  func.func @transform_6(%arg0: i32, %arg1: i32) -> (i32, i32) {
    %c0_i32 = arith.constant 0 : i32
    %c0_i32_0 = arith.constant 0 : i32
    %c0_i32_1 = arith.constant 0 : i32
    return %c0_i32, %c0_i32_0 : i32, i32
  }
  func.func @transform_7(%arg0: i32, %arg1: i32) -> (i32, i32, i32) {
    %c0_i32 = arith.constant 0 : i32
    %c0_i32_0 = arith.constant 0 : i32
    return %arg0, %arg1, %c0_i32 : i32, i32, i32
  }
  func.func @transform_8(%arg0: i32, %arg1: i32) -> (i32, i32, i32) {
    %c0_i32 = arith.constant 0 : i32
    %c0_i32_0 = arith.constant 0 : i32
    return %arg0, %arg1, %c0_i32 : i32, i32, i32
  }
  func.func @transform_9(%arg0: i32, %arg1: i32) -> (i32, i32, i32) {
    %c0_i32 = arith.constant 0 : i32
    %c0_i32_0 = arith.constant 0 : i32
    return %arg0, %arg1, %c0_i32 : i32, i32, i32
  }
}

</mosaic_0001>

<bundles_post_ra>
// kernel: tpu_custom_call.1
= control target key start
LH: loop header
LB: loop body
LE: loop exit
PB: predicated region body
PF: predicated region fallthrough
CT: control target
= control target key end

     0   :  { %s1812_s0 = inlined_call_operand.hbm [shape: f32[2,8,32], index: 0, kind: input, shape index: {}]   ;;  %s1813_s1 = inlined_call_operand.hbm [shape: f32[32,32], index: 1, kind: input, shape index: {}]   ;;  %s1814_s2 = inlined_call_operand.vmem [shape: f32[1,32], index: 2, kind: input, shape index: {}]   ;;  %s1815_s3 = inlined_call_operand.hbm [shape: f32[32,32], index: 3, kind: input, shape index: {}]   ;;  %s1816_s4 = inlined_call_operand.vmem [shape: f32[1,32], index: 4, kind: input, shape index: {}]   ;;  %s1817_s5 = inlined_call_operand.hbm [shape: f32[32,32], index: 5, kind: input, shape index: {}]   ;;  %s1818_s6 = inlined_call_operand.vmem [shape: f32[1,32], index: 6, kind: input, shape index: {}]   ;;  %s1819_s7 = inlined_call_operand.hbm [shape: f32[2,8,32], index: 7, kind: output, shape index: {0}]   ;;  %s1820_s8 = inlined_call_operand.hbm [shape: f32[2,8,32], index: 8, kind: output, shape index: {1}]   ;;  %s1821_s9 = inlined_call_operand.hbm [shape: f32[2,8,32], index: 9, kind: output, shape index: {2}]  }
   0x1   :  { %1830 = sst [smem:[#allocation21_spill]] %s1812_s0 }
   0x2   :  { %1831 = sst [smem:[#allocation22_spill]] %s1818_s6 }
   0x3   :  { %1832 = sst [smem:[#allocation23_spill]] %s1820_s8 }
   0x4   :  { %1833 = sst [smem:[#allocation24_spill]] %s1821_s9 }
   0x5   :  { %15 = vsyncpa [#allocation3], 0 }
   0x6   :  { %17 = vsyncpa [#allocation3 + $0x1], 0 }
   0x7   :  { %18 = vsyncpa [#allocation6], 0 }
   0x8   :  { %19 = vsyncpa [#allocation9], 0 }
   0x9   :  { %20 = vsyncpa [#allocation4], 0 }
   0xa   :  { %22 = vsyncpa [#allocation4 + $0x1], 0 }
   0xb   :  { %23 = vsyncpa [#allocation12], 0 }
   0xc   :  { %25 = vsyncpa [#allocation12 + $0x1], 0  ;;  %s1440_s30 = smov 0   ;;  %s1442_s10 = smov 0  }
   0xd   :  { %s1444_s11 = smov 0   ;;  %s1446_s12 = smov 0  }
   0xe   :  { %s1448_s13 = smov 0   ;;  %s1450_s14 = smov 0  }
   0xf LB: > { %1834 = sst [smem:[#allocation19_spill]] %s1356_s30  ;;  %s1471_s15 = sadd.s32 4294967295, %s1376_s14   ;;  %s1376_s14 = sphi %s1450_s14, %s31_s14   ;;  %s1372_s13 = sphi %s1448_s13, %s1864_s13   ;;  %s1368_s12 = sphi %s1446_s12, %s1863_s12   ;;  %s1364_s11 = sphi %s1444_s11, %s1862_s11   ;;  %s1360_s10 = sphi %s1442_s10, %s1861_s10   ;;  %s1356_s30 = sphi %s1440_s30, %s1860_s30  }
  0x10   : > { %s1822_s16 = sadd.s32 4294967294, %s1376_s14   ;;  %p65_p0 = scmp.ne.s32.totalorder %s1360_s10, %s1356_s30 }
  0x11   : > { %p1824_p1 = scmp.eq.s32.totalorder %s1471_s15, 0  ;;  %p223_p3 = scmp.eq.s32.totalorder %s1822_s16, 1 }
  0x12   : > { %p909_p5 = scmp.ge.s32.totalorder %s1376_s14, 1  ;;  %p286_p7 = scmp.lt.s32.totalorder %s1376_s14, 3 }
  0x13   : > { %p1482_p4 = por %p1824_p1, %p65_p0  ;;  %p1487_p6 = por %p223_p3, %p65_p0 }
  0x14   : > { %p1492_p8 = pnand %p909_p5, %p286_p7  ;;  %s1378_s20 = smov [#allocation5]  }
  0x15   : > { %s1835_s17 = scalar_select %p1482_p4, 1, 0 }
  0x16   : > { %s1836_s18 = scalar_select %p1487_p6, 1, 0 }
  0x17   : > { %s1838_s19 = scalar_select %p1492_p8, 1, 0 }
  0x18   : > { %1837 = sst [smem:[#allocation20_spill]] %s1836_s18  ;;  %s298_s21 = sshll.u32 %s1378_s20, 4  ;;  %s1496_s21 = int_to_ptr.vmem [resolvable:$true] %s298_s21 }
  0x19   : > { %p1024_p9 = pneg %p1492_p8  ;;  %s1379_s23 = smov [#allocation7]  }
  0x1a   : > { %s314_s24 = sshll.u32 %s1379_s23, 4  ;;  %s1380_s25 = smov [#allocation8]   ;;  %s1507_s24 = int_to_ptr.vmem [resolvable:$true] %s314_s24 }
  0x1b   : > { %p1503_p11 = pnand %p1024_p9, %p1824_p1  ;;  %s1509_s26 = sshll.u32 %s1380_s25, 4  ;;  %s331_s26 = int_to_ptr.vmem [resolvable:$true] %s1509_s26 }
  0x1c   : > { %s1112_s29 = scalar_lea.hbm %s1813_s1, 512 }
  0x1d   : > { %p1113_p12 = scmp.ne.s32.totalorder %s1813_s1, %s1112_s29  ;;  %p1519_p13 = pneg %p1503_p11 }
  0x1e   : > { %p1119_p5 = scmp.lt.u32.totalorder %s1112_s29, %s1813_s1 }
  0x1f   : > { %p1115_p0 = pnand %p1519_p13, %p1113_p12 }
  0x21   : > { %p1116_p3 = pneg %p1115_p0 }
  0x23   : > { %p1121_p7 = pnand %p1119_p5, %p1116_p3 }
  0x25   : > { %1124 = shalt.err (!%p1121_p7)
}
  0x26   : > { %s1125_s16 = scalar_lea.vmem %s1496_s21, 512  ;;  %p1133_p2 = scmp.lt.s32.totalorder %s1496_s21, %s1496_s21 }
  0x27   : > { %p1126_p9 = scmp.ne.s32.totalorder %s1496_s21, %s1125_s16  ;;  %p1134_p6 = scmp.lt.s32.totalorder %s1125_s16, %s1125_s16 }
  0x29   : > { %p1128_p10 = pnand %p1126_p9, %p1519_p13  ;;  %p1135_p12 = por %p1134_p6, %p1133_p2 }
  0x2b   : > { %p1129_p1 = pneg %p1128_p10 }
  0x2d   : > { %p1136_p0 = pnand %p1135_p12, %p1129_p1 }
  0x2f   : > { %1139 = shalt.err (!%p1136_p0)
}
  0x30   : > { %s1381_s27 = smov 128   ;;  %s1382_s28 = smov 8  }
  0x31   : > { %1027 = dma.hbm_to_vmem [thread:$0]  (!%p1503_p11), %s1813_s1, 512, %s1496_s21, [#allocation6], %s1381_s27, %s1381_s27, %s1382_s28  }
  0x32   : > { %s1140_s16 = scalar_lea.hbm %s1815_s3, 512 }
  0x33   : > { %p1141_p1 = scmp.ne.s32.totalorder %s1815_s3, %s1140_s16  ;;  %p1147_p10 = scmp.lt.u32.totalorder %s1140_s16, %s1815_s3 }
  0x35   : > { %p1143_p2 = pnand %p1141_p1, %p1519_p13 }
  0x37   : > { %p1144_p6 = pneg %p1143_p2 }
  0x39   : > { %p1149_p3 = pnand %p1147_p10, %p1144_p6 }
  0x3b   : > { %1152 = shalt.err (!%p1149_p3)
}
  0x3c   : > { %s1153_s21 = scalar_lea.vmem %s1507_s24, 512  ;;  %p1161_p12 = scmp.lt.s32.totalorder %s1507_s24, %s1507_s24 }
  0x3d   : > { %p1154_p5 = scmp.ne.s32.totalorder %s1507_s24, %s1153_s21  ;;  %p1162_p0 = scmp.lt.s32.totalorder %s1153_s21, %s1153_s21 }
  0x3f   : > { %p1156_p7 = pnand %p1154_p5, %p1519_p13  ;;  %p1163_p1 = por %p1162_p0, %p1161_p12 }
  0x41   : > { %p1157_p9 = pneg %p1156_p7 }
  0x43   : > { %p1164_p2 = pnand %p1163_p1, %p1157_p9 }
  0x45   : > { %1167 = shalt.err (!%p1164_p2)
}
  0x46   : > { %1030 = dma.hbm_to_vmem [thread:$0]  (!%p1503_p11), %s1815_s3, 512, %s1507_s24, [#allocation6], %s1381_s27, %s1381_s27, %s1382_s28  }
  0x47   : > { %s1168_s29 = scalar_lea.hbm %s1817_s5, 512 }
  0x48   : > { %p1169_p6 = scmp.ne.s32.totalorder %s1817_s5, %s1168_s29  ;;  %p1175_p5 = scmp.lt.u32.totalorder %s1168_s29, %s1817_s5 }
  0x4a   : > { %p1171_p10 = pnand %p1169_p6, %p1519_p13 }
  0x4c   : > { %p1172_p3 = pneg %p1171_p10 }
  0x4e   : > { %p1177_p7 = pnand %p1175_p5, %p1172_p3 }
  0x50   : > { %1180 = shalt.err (!%p1177_p7)
}
  0x51   : > { %s1181_s21 = scalar_lea.vmem %s331_s26, 512  ;;  %p1189_p1 = scmp.lt.s32.totalorder %s331_s26, %s331_s26 }
  0x52   : > { %p1182_p9 = scmp.ne.s32.totalorder %s331_s26, %s1181_s21  ;;  %p1190_p2 = scmp.lt.s32.totalorder %s1181_s21, %s1181_s21 }
  0x54   : > { %p1184_p12 = pnand %p1182_p9, %p1519_p13  ;;  %p1191_p4 = por %p1190_p2, %p1189_p1 }
  0x56   : > { %p1185_p0 = pneg %p1184_p12 }
  0x58   : > { %p1192_p8 = pnand %p1191_p4, %p1185_p0 }
  0x5a   : > { %1195 = shalt.err (!%p1192_p8)
}
  0x5b   : > { %1033 = dma.hbm_to_vmem [thread:$0]  (!%p1503_p11), %s1817_s5, 512, %s331_s26, [#allocation9], %s1381_s27, %s1381_s27, %s1382_s28  }
  0x5c   : > { %s52_s18 = sadd.s32 1, %s1364_s11  ;;  %s43_s22 = sadd.s32 1, %s1372_s13 }
  0x5d   : > { %p59_p4 = scmp.ne.s32.totalorder %s1364_s11, %s1360_s10  ;;  %p45_p8 = scmp.ge.s32.totalorder %s43_s22, 2 }
  0x5e   : > { %p60_p13 = scmp.eq.s32.totalorder %s1376_s14, 0  ;;  %p1841_p6 = scmp.eq.s32.totalorder %s1471_s15, 1 }
  0x5f   : > { %p1051_p3 = scmp.lt.s32.totalorder %s1376_s14, 2  ;;  %s1866_s22 = smov (%p45_p8, %s43_s22), 0 }
  0x60   : > { %p1598_p10 = por %p1841_p6, %p59_p4  ;;  %p61_p5 = por %p60_p13, %p59_p4 }
  0x61   : > { %s347_s9 = sand.u32 1, %s1364_s11   ;;  %s47_s30 = ssub.s32 %s1372_s13, %s1866_s22 }
  0x62   : > { %p50_p7 = scmp.eq.s32.totalorder %s47_s30, 0  ;;  %s914_s26 = sshll.u32 %s347_s9, 3 }
  0x63   : > { %s915_s27 = sshll.u32 %s1372_s13, 7  ;;  %s1843_s0 = sld [smem:[#allocation21_spill]] }
  0x64   : > { %s1610_s28 = scalar_select %p50_p7, %s1364_s11, %s52_s18  }
  0x65   : > { %s351_s25 = scalar_lea.vmem [#allocation2], %s914_s26  ;;  %p1621_p11 = pnand %p1051_p3, %p61_p5 }
  0x66   : > { %s359_s16 = sshll.u32 %s351_s25, 4  ;;  %s348_s24 = scalar_lea.sflag [#allocation3], %s347_s9  ;;  %s1617_s16 = int_to_ptr.vmem [resolvable:$true] %s359_s16 }
  0x67   : > { %p1198_p12 = pneg %p1621_p11 }
  0x69   : > { %s1615_s23 = scalar_lea.hbm %s1843_s0, %s915_s27  ;;  %s1201_s26 = scalar_lea.hbm %s1843_s0, 256 }
  0x6a   : > { %s1196_s6 = scalar_lea.hbm %s1615_s23, 128  ;;  %p1202_p2 = scmp.lt.u32.totalorder %s1615_s23, %s1843_s0 }
  0x6b   : > { %p1197_p9 = scmp.ne.s32.totalorder %s1615_s23, %s1196_s6  ;;  %p1203_p4 = scmp.lt.u32.totalorder %s1201_s26, %s1196_s6 }
  0x6c   : > { %p1205_p13 = scmp.lt.u32.totalorder %s1196_s6, %s1615_s23 }
  0x6d   : > { %p1199_p0 = pnand %p1198_p12, %p1197_p9  ;;  %p1204_p8 = por %p1203_p4, %p1202_p2 }
  0x6f   : > { %p1200_p1 = pneg %p1199_p0  ;;  %p1206_p6 = por %p1205_p13, %p1204_p8 }
  0x71   : > { %p1207_p3 = pnand %p1206_p6, %p1200_p1 }
  0x73   : > { %1210 = shalt.err (!%p1207_p3)
}
  0x74   : > { %s1211_s9 = scalar_lea.vmem %s1617_s16, 128  ;;  %s1383_s20 = smov [#allocation2]  }
  0x75   : > { %p1212_p5 = scmp.ne.s32.totalorder %s1617_s16, %s1211_s9  ;;  %s1216_s25 = sshll.u32 %s1383_s20, 4  ;;  %s1217_s25 = int_to_ptr.vmem [resolvable:$false] %s1216_s25 }
  0x76   : > { %s1218_s18 = scalar_lea.vmem %s1217_s25, 256  ;;  %p1219_p0 = scmp.lt.s32.totalorder %s1617_s16, %s1217_s25 }
  0x77   : > { %p1214_p7 = pnand %p1212_p5, %p1198_p12  ;;  %p1220_p2 = scmp.lt.s32.totalorder %s1218_s18, %s1211_s9 }
  0x79   : > { %p1215_p9 = pneg %p1214_p7  ;;  %p1221_p4 = por %p1220_p2, %p1219_p0 }
  0x7b   : > { %p1222_p8 = pnand %p1221_p4, %p1215_p9 }
  0x7d   : > { %1225 = shalt.err (!%p1222_p8)
}
  0x7e   : > { %1037 = dma.hbm_to_vmem [thread:$0]  (!%p1621_p11), %s1615_s23, 128, %s1617_s16, %s348_s24  }
  0x7f   : > { %p1845_p1 = scmp.ne.s32.totalorder %s1838_s19, 0 }
  0x80   : > { %s1653_s6 = sand.u32 (!%p1845_p1), 1, %s1360_s10   ;;  %p1846_p12 = scmp.ne.s32.totalorder (!%p1845_p1), %s1835_s17, 0 }
  0x81   : > { %368 = sbr.rel (%p1845_p1) target bundleno = 432 (0x1b0), region = 48  ;;  %s1656_s30 = sshll.u32 (!%p1845_p1), %s1653_s6, 3 }
  0x82   : > { %s371_s26 = scalar_lea.sflag (!%p1845_p1), [#allocation3], %s1653_s6  ;;  %s374_s27 = scalar_lea.vmem (!%p1845_p1), [#allocation2], %s1656_s30 }
  0x88   : > { %1335 = dma.done.wait (%p1846_p12), %s371_s26, 128  }
  0x89   : > { %1337 = vsyncadd (%p1846_p12), %s371_s26, 4294967168  ;;  %p1847_p11 = scmp.eq.s32.totalorder %s1471_s15, 0 }
  0x8b   : > { %1339 = dma.done.wait (%p1847_p11), [#allocation6], 1024   ;;  %p1848_p13 = pmov %p1847_p11 }
  0x8c   : > { %p1849_p6 = pmov %p1847_p11 }
  0x8d   : > { %1341 = vsyncadd (%p1848_p13), [#allocation6], 4294966272 }
  0x8e   : > { %1343 = dma.done.wait (%p1849_p6), [#allocation9], 512   ;;  %p1850_p3 = pmov %p1849_p6 }
  0x8f   : > { %v1384_v0 = vmov 0.0|0.0   ;;  %vm1385_vm0 = vmmov 0   ;;  %v1386_v1 = vmov 0.0   ;;  %v432_v2 = vld [vmem:[#allocation5] sm:$0xff]  ;;  %v433_v3 = vld [vmem:[#allocation5 + $0x8] sm:$0xff]  ;;  %v434_v4 = vld [vmem:[#allocation5 + $0x10] sm:$0xff] }
  0x90   : > { %1345 = vsyncadd (%p1850_p3), [#allocation9], 4294966784  ;;  %986 = vmatprep.subr.bf16.mxu0 %v1384_v0  ;;  %992 = vmatprep.subr.bf16.mxu1 %v1384_v0  ;;  %v987_v5 = vpack.c.bf16 %v433_v3, %v432_v2  ;;  %v435_v6 = vld [vmem:[#allocation5 + $0x18] sm:$0xff]  ;;  %v517_v7 = vld [vmem:[#allocation7] sm:$0xff]  ;;  %vm443_vm1 = vcmask 261120   ;;  %s1685_s16 = sshll.u32 %s1368_s12, 7 }
  0x91   : > { %961 = vmatprep.mubr.msk.f32.mxu0 %vm1385_vm0, %v1386_v1  ;;  %972 = vmatprep.mubr.msk.f32.mxu1 %vm1385_vm0, %v1386_v1  ;;  %v518_v8 = vld [vmem:[#allocation7 + $0x8] sm:$0xff]  ;;  %v990_v10 = vpack.c.bf16 %v435_v6, %v434_v4  ;;  %v519_v11 = vld [vmem:[#allocation7 + $0x10] sm:$0xff]  ;;  %v520_v12 = vld [vmem:[#allocation7 + $0x18] sm:$0xff]  ;;  %s416_s21 = scalar_lea.vmem [#allocation10], %s1656_s30  ;;  %s423_s20 = scalar_lea.vmem [#allocation11], %s1656_s30 }
  0x92   : > { %v993_v9 = vpack.c.bf16 %v518_v8, %v517_v7  ;;  %988 = vmatpush3.bf16.msra.mxu0 %v987_v5  ;;  %v598_v13 = vld [vmem:[#allocation8] sm:$0xff]  ;;  %v599_v14 = vld [vmem:[#allocation8 + $0x8] sm:$0xff]  ;;  %v996_v15 = vpack.c.bf16 %v520_v12, %v519_v11  ;;  %v431_v16 = vld [vmem:[%s374_s27] sm:$0xff]  ;;  %s707_s24 = sshll.u32 %s416_s21, 4  ;;  %s721_s25 = sshll.u32 %s423_s20, 4  ;;  %s1698_s24 = int_to_ptr.vmem [resolvable:$true] %s707_s24  ;;  %s1706_s25 = int_to_ptr.vmem [resolvable:$true] %s721_s25 }
  0x93   : > { %989 = vmatprep.subr.bf16.mxu0 %v1384_v0  ;;  %v999_v17 = vpack.c.bf16 %v599_v14, %v598_v13  ;;  %v600_v18 = vld [vmem:[#allocation8 + $0x10] sm:$0xff]  ;;  %v601_v19 = vld [vmem:[#allocation8 + $0x18] sm:$0xff]  ;;  %s1696_s12 = scalar_lea.hbm %s1819_s7, %s1685_s16  ;;  %s1851_s23 = sld [smem:[#allocation23_spill]] }
  0x94   : > { %994 = vmatpush3.bf16.msra.mxu1 %v993_v9  ;;  %v1002_v20 = vpack.c.bf16 %v601_v19, %v600_v18  ;;  %v924_v21 = vld [vmem:[%s1814_s2] ss:$0 sm:$0xff]  ;;  %s683_s9 = scalar_lea.sflag [#allocation4], %s1653_s6  ;;  %s1226_s18 = scalar_lea.vmem %s1698_s24, 128 }
  0x95   : > { %995 = vmatprep.subr.bf16.mxu1 %v1384_v0  ;;  %v926_v22 = vld [vmem:[%s1816_s4] ss:$0 sm:$0xff]  ;;  %p1227_p5 = scmp.ne.s32.totalorder %s1698_s24, %s1226_s18  ;;  %s1387_s26 = smov [#allocation10]  }
  0x96   : > { %991 = vmatpush3.bf16.msra.mxu0 %v990_v10  ;;  %s1230_s17 = sshll.u32 %s1387_s26, 4  ;;  %s1231_s17 = int_to_ptr.vmem [resolvable:$false] %s1230_s17 }
  0x97   : > { %998 = vmatprep.subr.bf16.mxu0 %v1384_v0  ;;  %p1228_p7 = pnand %p1227_p5, %p1598_p10  ;;  %s1232_s0 = scalar_lea.vmem %s1231_s17, 256 }
  0x98   : > { %997 = vmatpush3.bf16.msra.mxu1 %v996_v15  ;;  %p1233_p0 = scmp.lt.s32.totalorder %s1698_s24, %s1231_s17  ;;  %p1234_p2 = scmp.lt.s32.totalorder %s1232_s0, %s1226_s18 }
  0x99   : > { %962 = vmatmul.mubr.msk.f32.vlgmr.msra.gmra.mrb[0].mxu0 %vm443_vm1, %v431_v16  ;;  %s1704_s29 = scalar_lea.hbm %s1851_s23, %s1685_s16  ;;  %p1229_p9 = pneg %p1228_p7 }
  0x9a   : > { %1000 = vmatpush3.bf16.msra.mxu0 %v999_v17  ;;  %983 = vmatprep.mubr.msk.f32.mxu0 %vm1385_vm0, %v1386_v1  ;;  %p1235_p4 = por %p1234_p2, %p1233_p0 }
  0x9b   : > { %973 = vmatmul.mubr.msk.f32.vlgmr.msra.gmra.mrb[0].mxu1 %vm443_vm1, %v431_v16  ;;  %1001 = vmatprep.subr.bf16.mxu0 %v1384_v0 }
  0x9c   : > { %p1236_p8 = pnand %p1235_p4, %p1229_p9 }
  0x9e   : > { %1003 = vmatpush3.bf16.msra.mxu0 %v1002_v20 }
  0xa1   : > { %984 = vmatmul.mubr.msk.f32.vlgmr.msra.gmra.mrb[2].mxu0 %vm443_vm1, %v431_v16 }
 0x16c   : > { %v513_v23 = vpop.f32.mrb[0].mxu0 }
 0x16d   : > { %v514_v24 = vadd.f32 %v924_v21, %v513_v23  ;;  %v963_v25 = vpop.f32.mrb[1].mxu0 }
 0x16e   : > { %v594_v26 = vpop.f32.mrb[0].mxu1 }
 0x16f   : > { %v595_v27 = vadd.f32 %v926_v22, %v594_v26  ;;  %v974_v28 = vpop.f32.mrb[1].mxu1  ;;  %679 = vst.msk [vmem:[%s416_s21] sm:$0xff] %vm443_vm1, %v514_v24 }
 0x171   : > { %680 = vst.msk [vmem:[%s423_s20] sm:$0xff] %vm443_vm1, %v595_v27 }
 0x172   : > { %1239 = shalt.err (!%p1236_p8)
}
 0x173   : > { %s1240_s6 = scalar_lea.hbm %s1696_s12, 128  ;;  %s1244_s27 = scalar_lea.hbm %s1819_s7, 256 }
 0x174   : > { %p1241_p1 = scmp.ne.s32.totalorder %s1696_s12, %s1240_s6  ;;  %p1245_p13 = scmp.lt.u32.totalorder %s1696_s12, %s1819_s7 }
 0x175   : > { %p1246_p6 = scmp.lt.u32.totalorder %s1244_s27, %s1240_s6  ;;  %p1248_p5 = scmp.lt.u32.totalorder %s1240_s6, %s1696_s12 }
 0x176   : > { %p1242_p12 = pnand %p1241_p1, %p1598_p10 }
 0x177   : > { %p1247_p3 = por %p1246_p6, %p1245_p13 }
 0x178   : > { %p1243_p11 = pneg %p1242_p12 }
 0x179   : > { %p1249_p7 = por %p1248_p5, %p1247_p3 }
 0x17b   : > { %p1250_p9 = pnand %p1249_p7, %p1243_p11 }
 0x17d   : > { %1253 = shalt.err (!%p1250_p9)
}
 0x17e   : > { %1018 = dma.vmem_to_hbm [thread:$0]  (%p1598_p10), %s1698_s24, 128, %s1696_s12, %s683_s9  }
 0x17f   : > { %s1852_s0 = sand.u32 1, %s1471_s15   ;;  %s1254_s26 = scalar_lea.vmem %s1706_s25, 128 }
 0x180   : > { %s1734_s18 = scalar_lea.sflag [#allocation12], %s1852_s0  ;;  %p1255_p0 = scmp.ne.s32.totalorder %s1706_s25, %s1254_s26 }
 0x181   : > { %s1388_s6 = smov [#allocation11]  }
 0x182   : > { %p1256_p2 = pnand %p1255_p0, %p1598_p10  ;;  %s1258_s21 = sshll.u32 %s1388_s6, 4  ;;  %s1259_s21 = int_to_ptr.vmem [resolvable:$false] %s1258_s21 }
 0x183   : > { %s1260_s20 = scalar_lea.vmem %s1259_s21, 256  ;;  %p1261_p8 = scmp.lt.s32.totalorder %s1706_s25, %s1259_s21 }
 0x184   : > { %p1257_p4 = pneg %p1256_p2  ;;  %p1262_p1 = scmp.lt.s32.totalorder %s1260_s20, %s1254_s26 }
 0x186   : > { %p1263_p12 = por %p1262_p1, %p1261_p8 }
 0x188   : > { %p1264_p11 = pnand %p1263_p12, %p1257_p4 }
 0x18a   : > { %1267 = shalt.err (!%p1264_p11)
}
 0x18b   : > { %s1268_s15 = scalar_lea.hbm %s1704_s29, 128  ;;  %s1272_s9 = scalar_lea.hbm %s1851_s23, 256 }
 0x18c   : > { %p1269_p13 = scmp.ne.s32.totalorder %s1704_s29, %s1268_s15  ;;  %p1273_p5 = scmp.lt.u32.totalorder %s1704_s29, %s1851_s23 }
 0x18d   : > { %p1274_p7 = scmp.lt.u32.totalorder %s1272_s9, %s1268_s15  ;;  %p1276_p0 = scmp.lt.u32.totalorder %s1268_s15, %s1704_s29 }
 0x18e   : > { %p1270_p6 = pnand %p1269_p13, %p1598_p10 }
 0x18f   : > { %p1275_p9 = por %p1274_p7, %p1273_p5 }
 0x190   : > { %p1271_p3 = pneg %p1270_p6 }
 0x191   : > { %p1277_p2 = por %p1276_p0, %p1275_p9 }
 0x193   : > { %p1278_p4 = pnand %p1277_p2, %p1271_p3 }
 0x195   : > { %1281 = shalt.err (!%p1278_p4)
}
 0x196   : > { %1019 = dma.vmem_to_hbm [thread:$0]  (%p1598_p10), %s1706_s25, 128, %s1704_s29, %s1734_s18   ;;  %v675_v30 = vpop.f32.mrb[2].mxu0 }
 0x197   : > { %s1853_s26 = sld [smem:[#allocation22_spill]]  ;;  %s430_s6 = scalar_lea.vmem [#allocation13], %s1656_s30  ;;  %v985_v32 = vpop.f32.mrb[3].mxu0 }
 0x198   : > { %s735_s21 = sshll.u32 %s430_s6, 4  ;;  %s1854_s24 = sld [smem:[#allocation24_spill]]  ;;  %s736_s21 = int_to_ptr.vmem [resolvable:$true] %s735_s21 }
 0x199   : > { %s1282_s9 = scalar_lea.vmem %s736_s21, 128  ;;  %s1389_s25 = smov [#allocation13]  }
 0x19a   : > { %p1283_p8 = scmp.ne.s32.totalorder %s736_s21, %s1282_s9  ;;  %s1286_s29 = sshll.u32 %s1389_s25, 4  ;;  %s1287_s29 = int_to_ptr.vmem [resolvable:$false] %s1286_s29 }
 0x19b   : > { %s1288_s30 = scalar_lea.vmem %s1287_s29, 256  ;;  %p1289_p11 = scmp.lt.s32.totalorder %s736_s21, %s1287_s29 }
 0x19c   : > { %p1284_p1 = pnand %p1283_p8, %p1598_p10  ;;  %p1290_p13 = scmp.lt.s32.totalorder %s1288_s30, %s1282_s9 }
 0x19d   : > { %v928_v29 = vld [vmem:[%s1853_s26] ss:$0 sm:$0xff] }
 0x19e   : > { %v676_v31 = vadd.f32 %v928_v29, %v675_v30  ;;  %s1766_s12 = scalar_lea.hbm %s1854_s24, %s1685_s16  ;;  %p1285_p12 = pneg %p1284_p1 }
 0x19f   : > { %p1291_p6 = por %p1290_p13, %p1289_p11 }
 0x1a0   : > { %681 = vst.msk [vmem:[%s430_s6] sm:$0xff] %vm443_vm1, %v676_v31 }
 0x1a1   : > { %p1292_p3 = pnand %p1291_p6, %p1285_p12 }
 0x1a3   : > { %1295 = shalt.err (!%p1292_p3)
}
 0x1a4   : > { %s1296_s16 = scalar_lea.hbm %s1766_s12, 128  ;;  %s1300_s17 = scalar_lea.hbm %s1854_s24, 256 }
 0x1a5   : > { %p1297_p5 = scmp.ne.s32.totalorder %s1766_s12, %s1296_s16  ;;  %p1301_p0 = scmp.lt.u32.totalorder %s1766_s12, %s1854_s24 }
 0x1a6   : > { %p1302_p2 = scmp.lt.u32.totalorder %s1300_s17, %s1296_s16  ;;  %p1304_p8 = scmp.lt.u32.totalorder %s1296_s16, %s1766_s12 }
 0x1a7   : > { %p1298_p7 = pnand %p1297_p5, %p1598_p10 }
 0x1a8   : > { %p1303_p4 = por %p1302_p2, %p1301_p0 }
 0x1a9   : > { %p1299_p9 = pneg %p1298_p7 }
 0x1aa   : > { %p1305_p1 = por %p1304_p8, %p1303_p4 }
 0x1ac   : > { %p1306_p12 = pnand %p1305_p1, %p1299_p9 }
 0x1ae   : > { %1309 = shalt.err (!%p1306_p12)
}
 0x1af   : > { %1020 = dma.vmem_to_hbm [thread:$0]  (%p1598_p10), %s736_s21, 128, %s1766_s12, %s1734_s18  }
 0x1b0 PF: > { %s1855_s6 = sld [smem:[#allocation19_spill]]  ;;  %s1856_s20 = sld [smem:[#allocation20_spill]] }
 0x1b1   : > { %p1858_p13 = scmp.ge.s32.totalorder %s1376_s14, 2 }
 0x1b6   : > { %s747_s15 = sand.u32 1, %s1855_s6   ;;  %p1857_p11 = scmp.ne.s32.totalorder %s1856_s20, 0 }
 0x1b7   : > { %s748_s9 = scalar_lea.sflag [#allocation4], %s747_s15 }
 0x1b8   : > { %p1039_p6 = pnand %p1858_p13, %p1857_p11 }
 0x1ba   : > { %1347 = dma.done.wait (!%p1039_p6), %s748_s9, 128  }
 0x1bb   : > { %1349 = vsyncadd (!%p1039_p6), %s748_s9, 4294967168  ;;  %s1859_s25 = sadd.s32 4294967294, %s1376_s14  }
 0x1bc   : > { %s756_s29 = sand.u32 1, %s1859_s25  }
 0x1bd   : > { %s757_s30 = scalar_lea.sflag [#allocation12], %s756_s29 }
 0x1be   : > { %1351 = dma.done.wait (!%p1039_p6), %s757_s30, 256  }
 0x1bf   : > { %1353 = vsyncadd (!%p1039_p6), %s757_s30, 4294967040  ;;  %s31_s14 = sadd.s32 1, %s1376_s14   ;;  %s1860_s30 = smov %s1360_s10 }
 0x1c0   : > { %p28_p10 = scmp.ge.s32.totalorder %s31_s14, 4   ;;  %s1861_s10 = smov %s1364_s11 }
 0x1c1   : > { %s1862_s11 = smov %s1610_s28  ;;  %s1863_s12 = smov %s1372_s13 }
 0x1c2   : > { %s1864_s13 = smov %s1866_s22  ;;  %30 = sbr.rel (!%p28_p10) target bundleno = 15 (0xf), region = 137 }
 0x1c9   :  { %771 = vsyncpa [#allocation3], 1 }
 0x1ca   :  { %773 = vsyncpa [#allocation3 + $0x1], 1 }
 0x1cb   :  { %774 = vsyncpa [#allocation6], 1 }
 0x1cc   :  { %775 = vsyncpa [#allocation9], 1 }
 0x1cd   :  { %776 = vsyncpa [#allocation4], 1 }
 0x1ce   :  { %778 = vsyncpa [#allocation4 + $0x1], 1 }
 0x1cf   :  { %779 = vsyncpa [#allocation12], 1 }
 0x1d0   :  { %781 = vsyncpa [#allocation12 + $0x1], 1 }

</bundles_post_ra>
